<compile_context>
chip_gen: v7x
topology: tpu7x:2x2x1
jax: 0.10.0
libtpu: 0.0.40
codegen_flags: <defaults>
</compile_context>

<pallas_src>
import math
import jax
import jax.numpy as jnp
from jax.experimental import pallas as pl
from jax.experimental.pallas import tpu as pltpu


def _round_up(a, b):
    return ((a + b - 1) // b) * b


def _mlp_kernel(x_ref, w1_ref, b1_ref, w2_ref, b2_ref, o_ref):
    # x_ref:  (tm, I) row tile, NATIVE dtype (no upcast — MXU accumulates f32)
    # w1_ref: (I, H)  first linear weight (VMEM-resident across grid steps)
    # b1_ref: (1, H)  first linear bias
    # w2_ref: (H, O)  second linear weight
    # b2_ref: (1, O)  second linear bias
    # o_ref:  (tm, O) output tile, final row-major layout (no wrapper transpose)
    h = jnp.dot(x_ref[...], w1_ref[...], preferred_element_type=jnp.float32)
    # Dropout == identity (inference). Bias-add + ReLU stay in-kernel: they are
    # VPU filler hidden under MXU slack (hoisting them is an anti-pattern).
    h = jnp.maximum(h + b1_ref[...], 0.0)
    out = jnp.dot(h.astype(w2_ref.dtype), w2_ref[...],
                  preferred_element_type=jnp.float32) + b2_ref[...]
    o_ref[...] = out.astype(o_ref.dtype)


def mlp_forward(x, w1, b1, w2, b2, *, block_m=None):
    """Inference-mode MLP forward.

    x: (..., I); w1: (I, H); b1: (H,); w2: (H, O); b2: (O,). Returns (..., O).
    Weights are stored (in, out), i.e. transposed relative to the PyTorch
    nn.Linear (out, in) layout. Dropout is the identity (eval mode only).
    """
    I = x.shape[-1]
    H = w1.shape[1]
    O = w2.shape[1]
    lead_shape = x.shape[:-1]

    # Flatten leading dims -> rows (row-major reshape, no data movement).
    x2 = x.reshape(-1, I)
    M = x2.shape[0]

    # Generation-aware row tile.
    if block_m is None:
        kind = jax.devices()[0].device_kind.lower()
        block_m = 128 if "v5" in kind else 256
    if M <= 128:
        tm = M  # single full-extent row block (exempt from the 8-row rule)
    else:
        # Multiples of 128 rows; >= 2 grid steps once M >= 256 so the
        # "parallel" row axis can shard across v7x's two TensorCores.
        tm = min(block_m, _round_up(pl.cdiv(M, 2), 128))
    grid_m = pl.cdiv(M, tm)  # partial last block is masked by Pallas — no pad

    b1r = b1.reshape(1, H)
    b2r = b2.reshape(1, O)

    itemsize = jnp.dtype(x.dtype).itemsize
    # Double-buffered x/out row tiles + resident (still double-buffered by
    # default) weights/biases; 2x headroom, clamped to fit every generation
    # (v7x physical VMEM is 64 MiB per TensorCore).
    working = 2 * (tm * I + tm * O + I * H + H + H * O + O) * itemsize
    vmem_limit = int(min(max(2 * working, 4 * 1024 * 1024), 48 * 1024 * 1024))

    cost = pl.CostEstimate(
        flops=2 * M * (I * H + H * O),
        transcendentals=0,
        bytes_accessed=(M * I + I * H + H + H * O + O + M * O) * itemsize,
    )

    out = pl.pallas_call(
        _mlp_kernel,
        out_shape=jax.ShapeDtypeStruct((M, O), x.dtype),
        grid_spec=pltpu.PrefetchScalarGridSpec(
            num_scalar_prefetch=0,
            grid=(grid_m,),
            in_specs=[
                pl.BlockSpec((tm, I), lambda i: (i, 0)),  # x row tile
                pl.BlockSpec((I, H), lambda i: (0, 0)),   # W1 (resident)
                pl.BlockSpec((1, H), lambda i: (0, 0)),   # b1
                pl.BlockSpec((H, O), lambda i: (0, 0)),   # W2 (resident)
                pl.BlockSpec((1, O), lambda i: (0, 0)),   # b2
            ],
            out_specs=pl.BlockSpec((tm, O), lambda i: (i, 0)),
        ),
        compiler_params=pltpu.CompilerParams(
            dimension_semantics=("parallel",),
            vmem_limit_bytes=vmem_limit,
        ),
        cost_estimate=cost,
    )(x2, w1, b1r, w2, b2r)

    return out.reshape(*lead_shape, O)


def _ref_mlp(x, w1, b1, w2, b2):
    """Pure-JAX reference mirroring the PyTorch forward (dropout = identity)."""
    h = jnp.maximum(x @ w1 + b1, 0.0)
    return h @ w2 + b2


if __name__ == "__main__":
    # Module hyperparameters: I=32, O=32, hidden = I//2 = 16; dropout unused
    # at inference. Input: batch=2, seq=8, features=I.
    I, O, DROPOUT = 32, 32, 0.1
    H = I // 2
    B, S = 2, 8

    key = jax.random.PRNGKey(0)
    kx, kw1, kb1, kw2, kb2 = jax.random.split(key, 5)

    # nn.Linear-style init: uniform(-1/sqrt(fan_in), 1/sqrt(fan_in)).
    bound1 = 1.0 / math.sqrt(I)
    bound2 = 1.0 / math.sqrt(H)
    w1 = jax.random.uniform(kw1, (I, H), jnp.float32, -bound1, bound1)
    b1 = jax.random.uniform(kb1, (H,), jnp.float32, -bound1, bound1)
    w2 = jax.random.uniform(kw2, (H, O), jnp.float32, -bound2, bound2)
    b2 = jax.random.uniform(kb2, (O,), jnp.float32, -bound2, bound2)

    x = jax.random.normal(kx, (B, S, I), jnp.float32)

    out = mlp_forward(x, w1, b1, w2, b2)
    out = jax.block_until_ready(out)

    ref = _ref_mlp(x, w1, b1, w2, b2)
    assert out.shape == (B, S, O), out.shape
    assert jnp.allclose(out, ref, atol=1e-5, rtol=1e-5), "mismatch vs reference"

    print("KERNEL_OK")
</pallas_src>

<mosaic_0001>
module attributes {stable_mosaic.version = 11 : i64} {
  func.func @_mlp_kernel(%arg0: i32, %arg1: memref<16x32xf32, #tpu.memory_space<vmem>>, %arg2: memref<32x16xf32, #tpu.memory_space<vmem>>, %arg3: memref<1x16xf32, #tpu.memory_space<vmem>>, %arg4: memref<16x32xf32, #tpu.memory_space<vmem>>, %arg5: memref<1x32xf32, #tpu.memory_space<vmem>>, %arg6: memref<16x32xf32, #tpu.memory_space<vmem>>) attributes {dimension_semantics = [#tpu.dimension_semantics<parallel>], iteration_bounds = array<i64: 1>, scalar_prefetch = 0 : i64, scratch_operands = 0 : i64, tpu.core_type = #tpu.core_type<tc>, window_params = [{transform_indices = @transform_0, window_bounds = array<i64: 16, 32>}, {pipeline_mode = #tpu.pipeline_mode<synchronous>, transform_indices = @transform_1, window_bounds = array<i64: 32, 16>}, {pipeline_mode = #tpu.pipeline_mode<synchronous>, transform_indices = @transform_2, window_bounds = array<i64: 1, 16>}, {pipeline_mode = #tpu.pipeline_mode<synchronous>, transform_indices = @transform_3, window_bounds = array<i64: 16, 32>}, {pipeline_mode = #tpu.pipeline_mode<synchronous>, transform_indices = @transform_4, window_bounds = array<i64: 1, 32>}, {transform_indices = @transform_5, window_bounds = array<i64: 16, 32>}]} {
    %c0 = arith.constant 0 : index
    %c0_0 = arith.constant 0 : index
    %0 = vector.load %arg1[%c0, %c0_0] : memref<16x32xf32, #tpu.memory_space<vmem>>, vector<16x32xf32>
    %c0_1 = arith.constant 0 : index
    %c0_2 = arith.constant 0 : index
    %1 = vector.load %arg2[%c0_1, %c0_2] : memref<32x16xf32, #tpu.memory_space<vmem>>, vector<32x16xf32>
    %cst = arith.constant dense<0.000000e+00> : vector<16x16xf32>
    %2 = tpu.matmul %0, %1, %cst {dimension_numbers = #tpu.dot_dimension_numbers<[1], [0], [0], [1], [0, 0, 1, 1], [], []>} : vector<16x32xf32>, vector<32x16xf32>, vector<16x16xf32> -> vector<16x16xf32>
    %c0_3 = arith.constant 0 : index
    %c0_4 = arith.constant 0 : index
    %3 = vector.load %arg3[%c0_3, %c0_4] : memref<1x16xf32, #tpu.memory_space<vmem>>, vector<1x16xf32>
    %4 = vector.broadcast %3 : vector<1x16xf32> to vector<16x16xf32>
    %5 = arith.addf %2, %4 : vector<16x16xf32>
    %cst_5 = arith.constant 0.000000e+00 : f32
    %6 = vector.broadcast %cst_5 : f32 to vector<16x16xf32>
    %7 = arith.maximumf %5, %6 : vector<16x16xf32>
    %c0_6 = arith.constant 0 : index
    %c0_7 = arith.constant 0 : index
    %8 = vector.load %arg4[%c0_6, %c0_7] : memref<16x32xf32, #tpu.memory_space<vmem>>, vector<16x32xf32>
    %cst_8 = arith.constant dense<0.000000e+00> : vector<16x32xf32>
    %9 = tpu.matmul %7, %8, %cst_8 {dimension_numbers = #tpu.dot_dimension_numbers<[1], [0], [0], [1], [0, 0, 1, 1], [], []>} : vector<16x16xf32>, vector<16x32xf32>, vector<16x32xf32> -> vector<16x32xf32>
    %c0_9 = arith.constant 0 : index
    %c0_10 = arith.constant 0 : index
    %10 = vector.load %arg5[%c0_9, %c0_10] : memref<1x32xf32, #tpu.memory_space<vmem>>, vector<1x32xf32>
    %11 = vector.broadcast %10 : vector<1x32xf32> to vector<16x32xf32>
    %12 = arith.addf %9, %11 : vector<16x32xf32>
    %c0_11 = arith.constant 0 : index
    %c0_12 = arith.constant 0 : index
    %13 = vector.load %arg6[%c0_11, %c0_12] : memref<16x32xf32, #tpu.memory_space<vmem>>, vector<16x32xf32>
    tpu.vector_store %arg6[%c0_11, %c0_12], %12 {strides = array<i32>} : memref<16x32xf32, #tpu.memory_space<vmem>>, vector<16x32xf32>,
    return
  }
  func.func @transform_0(%arg0: i32) -> (i32, i32) {
    %c0_i32 = arith.constant 0 : i32
    %c0_i32_0 = arith.constant 0 : i32
    return %arg0, %c0_i32 : i32, i32
  }
  func.func @transform_1(%arg0: i32) -> (i32, i32) {
    %c0_i32 = arith.constant 0 : i32
    %c0_i32_0 = arith.constant 0 : i32
    %c0_i32_1 = arith.constant 0 : i32
    return %c0_i32, %c0_i32_0 : i32, i32
  }
  func.func @transform_2(%arg0: i32) -> (i32, i32) {
    %c0_i32 = arith.constant 0 : i32
    %c0_i32_0 = arith.constant 0 : i32
    %c0_i32_1 = arith.constant 0 : i32
    return %c0_i32, %c0_i32_0 : i32, i32
  }
  func.func @transform_3(%arg0: i32) -> (i32, i32) {
    %c0_i32 = arith.constant 0 : i32
    %c0_i32_0 = arith.constant 0 : i32
    %c0_i32_1 = arith.constant 0 : i32
    return %c0_i32, %c0_i32_0 : i32, i32
  }
  func.func @transform_4(%arg0: i32) -> (i32, i32) {
    %c0_i32 = arith.constant 0 : i32
    %c0_i32_0 = arith.constant 0 : i32
    %c0_i32_1 = arith.constant 0 : i32
    return %c0_i32, %c0_i32_0 : i32, i32
  }
  func.func @transform_5(%arg0: i32) -> (i32, i32) {
    %c0_i32 = arith.constant 0 : i32
    %c0_i32_0 = arith.constant 0 : i32
    return %arg0, %c0_i32 : i32, i32
  }
}

</mosaic_0001>

<bundles_post_ra>
// kernel: tpu_custom_call.1
= control target key start
LH: loop header
LB: loop body
LE: loop exit
PB: predicated region body
PF: predicated region fallthrough
CT: control target
= control target key end

     0   :  { %vm34_vm0 = vcmask 261120   ;;  %s379_s0 = inlined_call_operand.vmem [shape: f32[16,32], index: 0, kind: input, shape index: {}]   ;;  %s380_s1 = inlined_call_operand.vmem [shape: f32[32,16], index: 1, kind: input, shape index: {}]   ;;  %s381_s2 = inlined_call_operand.vmem [shape: f32[1,16], index: 2, kind: input, shape index: {}]   ;;  %s382_s3 = inlined_call_operand.vmem [shape: f32[16,32], index: 3, kind: input, shape index: {}]   ;;  %s383_s4 = inlined_call_operand.vmem [shape: f32[1,32], index: 4, kind: input, shape index: {}]   ;;  %s384_s5 = inlined_call_operand.hbm [shape: f32[16,32], index: 5, kind: output, shape index: {}]  }
   0x1   :  { %v23_v0 = vld [vmem:[%s380_s1] sm:$0xff]  ;;  %v24_v1 = vld [vmem:[%s380_s1 + $0x8] sm:$0xff]  ;;  %v25_v2 = vld [vmem:[%s380_s1 + $0x10] sm:$0xff] }
   0x2   :  { %v261_v3 = vpack.c.bf16 %v24_v1, %v23_v0  ;;  %v26_v4 = vld [vmem:[%s380_s1 + $0x18] sm:$0xff]  ;;  %v21_v5 = vld [vmem:[%s379_s0] sm:$0xff] }
   0x3   :  { %v265_v6 = vpack.c.bf16 %v26_v4, %v25_v2  ;;  %251 = vmatprep.mubr.msk.f32.mxu0 %vm34_vm0, %v21_v5 }
   0x4   :  { %10 = vsyncpa [#allocation3], 0  ;;  %262 = vmatprep.subr.bf16.mxu0 %v261_v3  ;;  %v22_v7 = vld [vmem:[%s379_s0 + $0x8] sm:$0xff]  ;;  %v118_v8 = vld [vmem:[%s382_s3] sm:$0xff]  ;;  %vm127_vm1 = vcmask 130048  }
   0x5   :  { %264 = vmatpush3.bf16.msra.mxu0 %v261_v3  ;;  %v119_v9 = vld [vmem:[%s382_s3 + $0x8] sm:$0xff]  ;;  %v227_v11 = vld [vmem:[%s381_s2] ss:$0 sm:$0xff]  ;;  %s300_s3 = smov [#allocation2]  }
   0x6   :  { %266 = vmatprep.subr.bf16.mxu0 %v265_v6  ;;  %v269_v10 = vpack.c.bf16 %v119_v9, %v118_v8  ;;  %v230_v18 = vld [vmem:[%s383_s4] ss:$0 sm:$0xff]  ;;  %s216_s11 = sshll.u32 %s300_s3, 4  ;;  %s217_s11 = int_to_ptr.vmem [resolvable:$true] %s216_s11 }
   0x7   :  { %s276_s2 = scalar_lea.vmem %s217_s11, 256  ;;  %p281_p1 = scmp.lt.s32.totalorder %s217_s11, %s217_s11 }
   0x8   :  { %270 = vmatprep.subr.bf16.mxu1 %v269_v10  ;;  %p277_p0 = scmp.ne.s32.totalorder %s217_s11, %s276_s2  ;;  %p282_p2 = scmp.lt.s32.totalorder %s276_s2, %s276_s2 }
   0x9   :  { %268 = vmatpush3.bf16.msra.mxu0 %v265_v6  ;;  %272 = vmatpush3.bf16.msra.mxu1 %v269_v10 }
   0xa   :  { %p283_p3 = por %p282_p2, %p281_p1 }
   0xc   :  { %252 = vmatmul.mubr.msk.f32.vlgmr.msra.gmra.mrb[0].mxu0 %vm34_vm0, %v22_v7  ;;  %p284_p4 = pnand %p283_p3, %p277_p0 }
  0xdf   :  { %v253_v12 = vpop.f32.mrb[0].mxu0 }
  0xe0   :  { %v113_v13 = vadd.f32 %v253_v12, %v227_v11  ;;  %v107_v14 = vpop.f32.mrb[1].mxu0 }
  0xe1   :  { %v108_v15 = vadd.f32 %v227_v11, %v107_v14 }
  0xe2   :  { %v117_v17 = vmax.f32 %v113_v13, 0.0 }
  0xe3   :  { %v116_v16 = vmax.f32 %v108_v15, 0.0 }
  0xe5   :  { %258 = vmatprep.mubr.msk.f32.mxu1 %vm127_vm1, %v116_v16 }
  0xe6   :  { %259 = vmatmul.mubr.msk.f32.vlgmr.msra.gmra.mrb[0].mxu1 %vm127_vm1, %v117_v17 }
 0x1b9   :  { %v260_v19 = vpop.f32.mrb[0].mxu1 }
 0x1ba   :  { %v206_v20 = vadd.f32 %v260_v19, %v230_v18  ;;  %v200_v21 = vpop.f32.mrb[1].mxu1 }
 0x1bb   :  { %v201_v22 = vadd.f32 %v230_v18, %v200_v21 }
 0x1bc   :  { %210 = vst.msk [vmem:[#allocation2 + $0x8] sm:$0xff] %vm34_vm0, %v206_v20 }
 0x1bd   :  { %209 = vst.msk [vmem:[#allocation2] sm:$0xff] %vm34_vm0, %v201_v22 }
 0x1be   :  { %287 = shalt.err (!%p284_p4)
}
 0x1bf   :  { %s288_s13 = scalar_lea.hbm %s384_s5, 256 }
 0x1c0   :  { %p289_p5 = scmp.ne.s32.totalorder %s384_s5, %s288_s13  ;;  %p292_p6 = scmp.lt.u32.totalorder %s288_s13, %s384_s5 }
 0x1c2   :  { %p294_p7 = pnand %p292_p6, %p289_p5 }
 0x1c4   :  { %297 = shalt.err (!%p294_p7)
}
 0x1c5   :  { %s301_s18 = smov 128   ;;  %s302_s19 = smov 8  }
 0x1c6   :  { %222 = dma.vmem_to_hbm [thread:$0]  %s217_s11, 256, %s384_s5, [#allocation3], %s301_s18, %s301_s18, %s302_s19  }
 0x1c7   :  { %298 = dma.done.wait [#allocation3], 256  }
 0x1c8   :  { %299 = vsyncadd [#allocation3], 4294967040 }
 0x1c9   :  { %226 = vsyncpa [#allocation3], 1 }

</bundles_post_ra>
